<compile_context>
chip_gen: v7x
topology: tpu7x:2x2x1
jax: 0.10.0
libtpu: 0.0.40
codegen_flags: <defaults>
</compile_context>

<pallas_src>
import jax
import jax.numpy as jnp
from jax.experimental import pallas as pl
from jax.experimental.pallas import tpu as pltpu

LANE = 128        # samples per lane row (lane-dense output/input slabs)
CHUNK = 32        # rows per in-kernel chunk: one (32,128) f32 slab = 4 vregs
TILE_ROWS = 1024  # max rows per grid step: 1024*128 = 131072 samples (~4 MiB dbl-buffered I/O)


def _round_up(a, b):
    return (a + b - 1) // b * b


def _cdiv(a, b):
    return -(-a // b)


def mlp_kernel(x_ref, p_ref, o_ref):
    # x_ref: (3, tile_r, 128) f32 VMEM; p_ref: (41,) f32 SMEM; o_ref: (tile_r, 128) f32 VMEM
    # Hoist all 41 SMEM scalar reads out of the chunk loop (read once per tile).
    w1 = [[p_ref[3 * j + k] for k in range(3)] for j in range(4)]
    b1 = [p_ref[12 + j] for j in range(4)]
    w2 = [[p_ref[16 + 4 * j + k] for k in range(4)] for j in range(4)]
    b2 = [p_ref[32 + j] for j in range(4)]
    w3 = [p_ref[36 + k] for k in range(4)]
    b3 = p_ref[40]

    n_chunks = x_ref.shape[1] // CHUNK  # static (tile_r is a multiple of CHUNK)

    def chunk(c, carry):
        r0 = pl.multiple_of(c * CHUNK, CHUNK)
        rows = pl.ds(r0, CHUNK)
        x = [x_ref[f, rows, :] for f in range(3)]          # 3 x (CHUNK,128) slabs

        # fc1 + ReLU (4 neurons, K=3) — pure VPU scalar*vector FMAs.
        h1 = []
        for j in range(4):
            a = b1[j] + w1[j][0] * x[0]
            a = a + w1[j][1] * x[1]
            a = a + w1[j][2] * x[2]
            h1.append(jnp.maximum(a, 0.0))

        # fc2 + ReLU (4 neurons, K=4) with fc3 accumulation interleaved, so
        # only one h2 slab is ever live (peak live ~8 slabs ~= 32 vregs).
        y = None
        for j in range(4):
            a = b2[j] + w2[j][0] * h1[0]
            for k in range(1, 4):
                a = a + w2[j][k] * h1[k]
            h2j = jnp.maximum(a, 0.0)
            y = (b3 + w3[0] * h2j) if j == 0 else (y + w3[j] * h2j)

        o_ref[rows, :] = y                                 # full-width lane-dense store
        return carry

    jax.lax.fori_loop(0, n_chunks, chunk, 0)


def _pack_params(params):
    w1, b1, w2, b2, w3, b3 = params
    return jnp.concatenate(
        [w1.reshape(-1), b1.reshape(-1), w2.reshape(-1),
         b2.reshape(-1), w3.reshape(-1), b3.reshape(-1)]).astype(jnp.float32)


def _choose_tiling(r):
    """Pick a row tile: multiple of CHUNK, capped at TILE_ROWS, and small enough
    that moderate batches still get >= 2 grid steps (v7x megacore sharding)."""
    tile_r = min(TILE_ROWS, _round_up(max(_cdiv(r, 2), 1), CHUNK))
    r_pad = _round_up(max(r, 1), tile_r)
    return tile_r, r_pad


def _launch(xt, packed, tile_r):
    """xt: (3, r_pad, 128) feature-major lane-dense input. Returns (r_pad, 128)."""
    r_pad = xt.shape[1]
    n_pad = r_pad * LANE
    grid = (r_pad // tile_r,)
    return pl.pallas_call(
        mlp_kernel,
        out_shape=jax.ShapeDtypeStruct((r_pad, LANE), jnp.float32),
        grid=grid,
        in_specs=[
            pl.BlockSpec((3, tile_r, LANE), lambda i: (0, i, 0)),     # x tile (double-buffered)
            pl.BlockSpec(memory_space=pltpu.MemorySpace.SMEM),         # packed 41 scalars
        ],
        out_specs=pl.BlockSpec((tile_r, LANE), lambda i: (i, 0)),
        compiler_params=pltpu.CompilerParams(
            dimension_semantics=("parallel",),   # v7x: shard batch tiles over 2 TCs
        ),
        cost_estimate=pl.CostEstimate(
            flops=72 * n_pad, transcendentals=0,
            bytes_accessed=16 * n_pad + 4 * 41),
    )(xt, packed)


def net_forward(x, params):
    """Forward pass of Net on sample-major input: x.view(-1, 3) -> fc1/relu -> fc2/relu -> fc3.

    Weights in PyTorch layout: W (out, in), b (out,). The pad + feature-major
    transpose is one fused XLA pass; for zero extra HBM passes use
    `net_forward_feature_major` with (3, N) input.
    """
    x2d = x.reshape(-1, 3).astype(jnp.float32)   # matches x.view(-1, 3*1)
    n = x2d.shape[0]
    r = _cdiv(n, LANE)
    tile_r, r_pad = _choose_tiling(r)
    n_pad = r_pad * LANE

    # Single fused layout pass (pad folds into the transpose copy).
    # TODO(synk): if the producer can emit x feature-major, skip this entirely.
    xt = jnp.pad(x2d, ((0, n_pad - n), (0, 0))).T.reshape(3, r_pad, LANE)

    out = _launch(xt, _pack_params(params), tile_r)
    y = out.reshape(n_pad, 1)
    return y if n == n_pad else y[:n]


def net_forward_feature_major(x_fm, params):
    """Fast path: x_fm is (3, N) feature-major. No transpose; reshape only
    (and a pad only if N is not a multiple of the tile size)."""
    assert x_fm.shape[0] == 3
    n = x_fm.shape[1]
    r = _cdiv(n, LANE)
    tile_r, r_pad = _choose_tiling(r)
    n_pad = r_pad * LANE
    x_fm = x_fm.astype(jnp.float32)
    if n_pad != n:
        x_fm = jnp.pad(x_fm, ((0, 0), (0, n_pad - n)))
    xt = x_fm.reshape(3, r_pad, LANE)            # contiguous split -> free

    out = _launch(xt, _pack_params(params), tile_r)
    y = out.reshape(n_pad, 1)
    return y if n == n_pad else y[:n]


def init_params(key):
    """nn.Linear-style init U(-1/sqrt(fan_in), 1/sqrt(fan_in)), PyTorch layout."""
    def linear(key, fan_in, fan_out):
        kw, kb = jax.random.split(key)
        bound = 1.0 / jnp.sqrt(fan_in)
        w = jax.random.uniform(kw, (fan_out, fan_in), jnp.float32, -bound, bound)
        b = jax.random.uniform(kb, (fan_out,), jnp.float32, -bound, bound)
        return w, b

    k1, k2, k3 = jax.random.split(key, 3)
    w1, b1 = linear(k1, 3, 4)
    w2, b2 = linear(k2, 4, 4)
    w3, b3 = linear(k3, 4, 1)
    return w1, b1, w2, b2, w3, b3


def _reference(x, params):
    w1, b1, w2, b2, w3, b3 = params
    x2d = x.reshape(-1, 3).astype(jnp.float32)
    h = jnp.maximum(x2d @ w1.T + b1, 0.0)
    h = jnp.maximum(h @ w2.T + b2, 0.0)
    return h @ w3.T + b3


if __name__ == "__main__":
    key = jax.random.PRNGKey(0)
    kx, kx2, kx3, kp = jax.random.split(key, 4)
    params = init_params(kp)

    # Small batch matching the module's flatten semantics: 8 samples of (3, 1).
    x = jax.random.normal(kx, (8, 3, 1), jnp.float32)
    out = jax.block_until_ready(net_forward(x, params))
    ref = _reference(x, params)
    assert out.shape == (8, 1)
    assert jnp.allclose(out, ref, atol=1e-5), "small-batch mismatch vs reference"

    # Moderate batch -> 2 grid steps (pipelined path + megacore-shardable grid).
    x_big = jax.random.normal(kx2, (40000, 3), jnp.float32)
    out_big = jax.block_until_ready(net_forward(x_big, params))
    ref_big = _reference(x_big, params)
    assert out_big.shape == (40000, 1)
    assert jnp.allclose(out_big, ref_big, atol=1e-4, rtol=1e-4), "tiled mismatch vs reference"

    # Feature-major fast path: no pad / transpose HBM pass at all.
    x_fm = jax.random.normal(kx3, (3, 65536), jnp.float32)
    out_fm = jax.block_until_ready(net_forward_feature_major(x_fm, params))
    ref_fm = _reference(x_fm.T, params)
    assert out_fm.shape == (65536, 1)
    assert jnp.allclose(out_fm, ref_fm, atol=1e-4, rtol=1e-4), "feature-major mismatch vs reference"

    print("KERNEL_OK")
</pallas_src>

<mosaic_0001>
module attributes {stable_mosaic.version = 11 : i64} {
  func.func @mlp_kernel(%arg0: i32, %arg1: memref<3x32x128xf32, #tpu.memory_space<vmem>>, %arg2: memref<41xf32, #tpu.memory_space<smem>>, %arg3: memref<32x128xf32, #tpu.memory_space<vmem>>) attributes {dimension_semantics = [#tpu.dimension_semantics<parallel>], iteration_bounds = array<i64: 1>, scalar_prefetch = 0 : i64, scratch_operands = 0 : i64, tpu.core_type = #tpu.core_type<tc>, window_params = [{transform_indices = @transform_0, window_bounds = array<i64: 3, 32, 128>}, {transform_indices = @transform_1, window_bounds = array<i64: 41>}, {transform_indices = @transform_2, window_bounds = array<i64: 32, 128>}]} {
    %c0 = arith.constant 0 : index
    %0 = memref.load %arg2[%c0] : memref<41xf32, #tpu.memory_space<smem>>
    %c1 = arith.constant 1 : index
    %1 = memref.load %arg2[%c1] : memref<41xf32, #tpu.memory_space<smem>>
    %c2 = arith.constant 2 : index
    %2 = memref.load %arg2[%c2] : memref<41xf32, #tpu.memory_space<smem>>
    %c3 = arith.constant 3 : index
    %3 = memref.load %arg2[%c3] : memref<41xf32, #tpu.memory_space<smem>>
    %c4 = arith.constant 4 : index
    %4 = memref.load %arg2[%c4] : memref<41xf32, #tpu.memory_space<smem>>
    %c5 = arith.constant 5 : index
    %5 = memref.load %arg2[%c5] : memref<41xf32, #tpu.memory_space<smem>>
    %c6 = arith.constant 6 : index
    %6 = memref.load %arg2[%c6] : memref<41xf32, #tpu.memory_space<smem>>
    %c7 = arith.constant 7 : index
    %7 = memref.load %arg2[%c7] : memref<41xf32, #tpu.memory_space<smem>>
    %c8 = arith.constant 8 : index
    %8 = memref.load %arg2[%c8] : memref<41xf32, #tpu.memory_space<smem>>
    %c9 = arith.constant 9 : index
    %9 = memref.load %arg2[%c9] : memref<41xf32, #tpu.memory_space<smem>>
    %c10 = arith.constant 10 : index
    %10 = memref.load %arg2[%c10] : memref<41xf32, #tpu.memory_space<smem>>
    %c11 = arith.constant 11 : index
    %11 = memref.load %arg2[%c11] : memref<41xf32, #tpu.memory_space<smem>>
    %c12 = arith.constant 12 : index
    %12 = memref.load %arg2[%c12] : memref<41xf32, #tpu.memory_space<smem>>
    %c13 = arith.constant 13 : index
    %13 = memref.load %arg2[%c13] : memref<41xf32, #tpu.memory_space<smem>>
    %c14 = arith.constant 14 : index
    %14 = memref.load %arg2[%c14] : memref<41xf32, #tpu.memory_space<smem>>
    %c15 = arith.constant 15 : index
    %15 = memref.load %arg2[%c15] : memref<41xf32, #tpu.memory_space<smem>>
    %c16 = arith.constant 16 : index
    %16 = memref.load %arg2[%c16] : memref<41xf32, #tpu.memory_space<smem>>
    %c17 = arith.constant 17 : index
    %17 = memref.load %arg2[%c17] : memref<41xf32, #tpu.memory_space<smem>>
    %c18 = arith.constant 18 : index
    %18 = memref.load %arg2[%c18] : memref<41xf32, #tpu.memory_space<smem>>
    %c19 = arith.constant 19 : index
    %19 = memref.load %arg2[%c19] : memref<41xf32, #tpu.memory_space<smem>>
    %c20 = arith.constant 20 : index
    %20 = memref.load %arg2[%c20] : memref<41xf32, #tpu.memory_space<smem>>
    %c21 = arith.constant 21 : index
    %21 = memref.load %arg2[%c21] : memref<41xf32, #tpu.memory_space<smem>>
    %c22 = arith.constant 22 : index
    %22 = memref.load %arg2[%c22] : memref<41xf32, #tpu.memory_space<smem>>
    %c23 = arith.constant 23 : index
    %23 = memref.load %arg2[%c23] : memref<41xf32, #tpu.memory_space<smem>>
    %c24 = arith.constant 24 : index
    %24 = memref.load %arg2[%c24] : memref<41xf32, #tpu.memory_space<smem>>
    %c25 = arith.constant 25 : index
    %25 = memref.load %arg2[%c25] : memref<41xf32, #tpu.memory_space<smem>>
    %c26 = arith.constant 26 : index
    %26 = memref.load %arg2[%c26] : memref<41xf32, #tpu.memory_space<smem>>
    %c27 = arith.constant 27 : index
    %27 = memref.load %arg2[%c27] : memref<41xf32, #tpu.memory_space<smem>>
    %c28 = arith.constant 28 : index
    %28 = memref.load %arg2[%c28] : memref<41xf32, #tpu.memory_space<smem>>
    %c29 = arith.constant 29 : index
    %29 = memref.load %arg2[%c29] : memref<41xf32, #tpu.memory_space<smem>>
    %c30 = arith.constant 30 : index
    %30 = memref.load %arg2[%c30] : memref<41xf32, #tpu.memory_space<smem>>
    %c31 = arith.constant 31 : index
    %31 = memref.load %arg2[%c31] : memref<41xf32, #tpu.memory_space<smem>>
    %c32 = arith.constant 32 : index
    %32 = memref.load %arg2[%c32] : memref<41xf32, #tpu.memory_space<smem>>
    %c33 = arith.constant 33 : index
    %33 = memref.load %arg2[%c33] : memref<41xf32, #tpu.memory_space<smem>>
    %c34 = arith.constant 34 : index
    %34 = memref.load %arg2[%c34] : memref<41xf32, #tpu.memory_space<smem>>
    %c35 = arith.constant 35 : index
    %35 = memref.load %arg2[%c35] : memref<41xf32, #tpu.memory_space<smem>>
    %c36 = arith.constant 36 : index
    %36 = memref.load %arg2[%c36] : memref<41xf32, #tpu.memory_space<smem>>
    %c37 = arith.constant 37 : index
    %37 = memref.load %arg2[%c37] : memref<41xf32, #tpu.memory_space<smem>>
    %c38 = arith.constant 38 : index
    %38 = memref.load %arg2[%c38] : memref<41xf32, #tpu.memory_space<smem>>
    %c39 = arith.constant 39 : index
    %39 = memref.load %arg2[%c39] : memref<41xf32, #tpu.memory_space<smem>>
    %c40 = arith.constant 40 : index
    %40 = memref.load %arg2[%c40] : memref<41xf32, #tpu.memory_space<smem>>
    %c0_i32 = arith.constant 0 : i32
    %c32_i32 = arith.constant 32 : i32
    %41 = arith.muli %c0_i32, %c32_i32 : i32
    %42 = tpu.assume_multiple %41, 32 : i32
    %c0_0 = arith.constant 0 : index
    %43 = arith.index_cast %42 : i32 to index
    %c0_1 = arith.constant 0 : index
    %44 = vector.load %arg1[%c0_0, %43, %c0_1] : memref<3x32x128xf32, #tpu.memory_space<vmem>>, vector<1x32x128xf32>
    %45 = vector.shape_cast %44 : vector<1x32x128xf32> to vector<32x128xf32>
    %c1_2 = arith.constant 1 : index
    %46 = arith.index_cast %42 : i32 to index
    %c0_3 = arith.constant 0 : index
    %47 = vector.load %arg1[%c1_2, %46, %c0_3] : memref<3x32x128xf32, #tpu.memory_space<vmem>>, vector<1x32x128xf32>
    %48 = vector.shape_cast %47 : vector<1x32x128xf32> to vector<32x128xf32>
    %c2_4 = arith.constant 2 : index
    %49 = arith.index_cast %42 : i32 to index
    %c0_5 = arith.constant 0 : index
    %50 = vector.load %arg1[%c2_4, %49, %c0_5] : memref<3x32x128xf32, #tpu.memory_space<vmem>>, vector<1x32x128xf32>
    %51 = vector.shape_cast %50 : vector<1x32x128xf32> to vector<32x128xf32>
    %52 = vector.broadcast %0 : f32 to vector<32x128xf32>
    %53 = arith.mulf %52, %45 : vector<32x128xf32>
    %54 = vector.broadcast %12 : f32 to vector<32x128xf32>
    %55 = arith.addf %54, %53 : vector<32x128xf32>
    %56 = vector.broadcast %1 : f32 to vector<32x128xf32>
    %57 = arith.mulf %56, %48 : vector<32x128xf32>
    %58 = arith.addf %55, %57 : vector<32x128xf32>
    %59 = vector.broadcast %2 : f32 to vector<32x128xf32>
    %60 = arith.mulf %59, %51 : vector<32x128xf32>
    %61 = arith.addf %58, %60 : vector<32x128xf32>
    %cst = arith.constant 0.000000e+00 : f32
    %62 = vector.broadcast %cst : f32 to vector<32x128xf32>
    %63 = arith.maximumf %61, %62 : vector<32x128xf32>
    %64 = vector.broadcast %3 : f32 to vector<32x128xf32>
    %65 = arith.mulf %64, %45 : vector<32x128xf32>
    %66 = vector.broadcast %13 : f32 to vector<32x128xf32>
    %67 = arith.addf %66, %65 : vector<32x128xf32>
    %68 = vector.broadcast %4 : f32 to vector<32x128xf32>
    %69 = arith.mulf %68, %48 : vector<32x128xf32>
    %70 = arith.addf %67, %69 : vector<32x128xf32>
    %71 = vector.broadcast %5 : f32 to vector<32x128xf32>
    %72 = arith.mulf %71, %51 : vector<32x128xf32>
    %73 = arith.addf %70, %72 : vector<32x128xf32>
    %cst_6 = arith.constant 0.000000e+00 : f32
    %74 = vector.broadcast %cst_6 : f32 to vector<32x128xf32>
    %75 = arith.maximumf %73, %74 : vector<32x128xf32>
    %76 = vector.broadcast %6 : f32 to vector<32x128xf32>
    %77 = arith.mulf %76, %45 : vector<32x128xf32>
    %78 = vector.broadcast %14 : f32 to vector<32x128xf32>
    %79 = arith.addf %78, %77 : vector<32x128xf32>
    %80 = vector.broadcast %7 : f32 to vector<32x128xf32>
    %81 = arith.mulf %80, %48 : vector<32x128xf32>
    %82 = arith.addf %79, %81 : vector<32x128xf32>
    %83 = vector.broadcast %8 : f32 to vector<32x128xf32>
    %84 = arith.mulf %83, %51 : vector<32x128xf32>
    %85 = arith.addf %82, %84 : vector<32x128xf32>
    %cst_7 = arith.constant 0.000000e+00 : f32
    %86 = vector.broadcast %cst_7 : f32 to vector<32x128xf32>
    %87 = arith.maximumf %85, %86 : vector<32x128xf32>
    %88 = vector.broadcast %9 : f32 to vector<32x128xf32>
    %89 = arith.mulf %88, %45 : vector<32x128xf32>
    %90 = vector.broadcast %15 : f32 to vector<32x128xf32>
    %91 = arith.addf %90, %89 : vector<32x128xf32>
    %92 = vector.broadcast %10 : f32 to vector<32x128xf32>
    %93 = arith.mulf %92, %48 : vector<32x128xf32>
    %94 = arith.addf %91, %93 : vector<32x128xf32>
    %95 = vector.broadcast %11 : f32 to vector<32x128xf32>
    %96 = arith.mulf %95, %51 : vector<32x128xf32>
    %97 = arith.addf %94, %96 : vector<32x128xf32>
    %cst_8 = arith.constant 0.000000e+00 : f32
    %98 = vector.broadcast %cst_8 : f32 to vector<32x128xf32>
    %99 = arith.maximumf %97, %98 : vector<32x128xf32>
    %100 = vector.broadcast %16 : f32 to vector<32x128xf32>
    %101 = arith.mulf %100, %63 : vector<32x128xf32>
    %102 = vector.broadcast %32 : f32 to vector<32x128xf32>
    %103 = arith.addf %102, %101 : vector<32x128xf32>
    %104 = vector.broadcast %17 : f32 to vector<32x128xf32>
    %105 = arith.mulf %104, %75 : vector<32x128xf32>
    %106 = arith.addf %103, %105 : vector<32x128xf32>
    %107 = vector.broadcast %18 : f32 to vector<32x128xf32>
    %108 = arith.mulf %107, %87 : vector<32x128xf32>
    %109 = arith.addf %106, %108 : vector<32x128xf32>
    %110 = vector.broadcast %19 : f32 to vector<32x128xf32>
    %111 = arith.mulf %110, %99 : vector<32x128xf32>
    %112 = arith.addf %109, %111 : vector<32x128xf32>
    %cst_9 = arith.constant 0.000000e+00 : f32
    %113 = vector.broadcast %cst_9 : f32 to vector<32x128xf32>
    %114 = arith.maximumf %112, %113 : vector<32x128xf32>
    %115 = vector.broadcast %36 : f32 to vector<32x128xf32>
    %116 = arith.mulf %115, %114 : vector<32x128xf32>
    %117 = vector.broadcast %40 : f32 to vector<32x128xf32>
    %118 = arith.addf %117, %116 : vector<32x128xf32>
    %119 = vector.broadcast %20 : f32 to vector<32x128xf32>
    %120 = arith.mulf %119, %63 : vector<32x128xf32>
    %121 = vector.broadcast %33 : f32 to vector<32x128xf32>
    %122 = arith.addf %121, %120 : vector<32x128xf32>
    %123 = vector.broadcast %21 : f32 to vector<32x128xf32>
    %124 = arith.mulf %123, %75 : vector<32x128xf32>
    %125 = arith.addf %122, %124 : vector<32x128xf32>
    %126 = vector.broadcast %22 : f32 to vector<32x128xf32>
    %127 = arith.mulf %126, %87 : vector<32x128xf32>
    %128 = arith.addf %125, %127 : vector<32x128xf32>
    %129 = vector.broadcast %23 : f32 to vector<32x128xf32>
    %130 = arith.mulf %129, %99 : vector<32x128xf32>
    %131 = arith.addf %128, %130 : vector<32x128xf32>
    %cst_10 = arith.constant 0.000000e+00 : f32
    %132 = vector.broadcast %cst_10 : f32 to vector<32x128xf32>
    %133 = arith.maximumf %131, %132 : vector<32x128xf32>
    %134 = vector.broadcast %37 : f32 to vector<32x128xf32>
    %135 = arith.mulf %134, %133 : vector<32x128xf32>
    %136 = arith.addf %118, %135 : vector<32x128xf32>
    %137 = vector.broadcast %24 : f32 to vector<32x128xf32>
    %138 = arith.mulf %137, %63 : vector<32x128xf32>
    %139 = vector.broadcast %34 : f32 to vector<32x128xf32>
    %140 = arith.addf %139, %138 : vector<32x128xf32>
    %141 = vector.broadcast %25 : f32 to vector<32x128xf32>
    %142 = arith.mulf %141, %75 : vector<32x128xf32>
    %143 = arith.addf %140, %142 : vector<32x128xf32>
    %144 = vector.broadcast %26 : f32 to vector<32x128xf32>
    %145 = arith.mulf %144, %87 : vector<32x128xf32>
    %146 = arith.addf %143, %145 : vector<32x128xf32>
    %147 = vector.broadcast %27 : f32 to vector<32x128xf32>
    %148 = arith.mulf %147, %99 : vector<32x128xf32>
    %149 = arith.addf %146, %148 : vector<32x128xf32>
    %cst_11 = arith.constant 0.000000e+00 : f32
    %150 = vector.broadcast %cst_11 : f32 to vector<32x128xf32>
    %151 = arith.maximumf %149, %150 : vector<32x128xf32>
    %152 = vector.broadcast %38 : f32 to vector<32x128xf32>
    %153 = arith.mulf %152, %151 : vector<32x128xf32>
    %154 = arith.addf %136, %153 : vector<32x128xf32>
    %155 = vector.broadcast %28 : f32 to vector<32x128xf32>
    %156 = arith.mulf %155, %63 : vector<32x128xf32>
    %157 = vector.broadcast %35 : f32 to vector<32x128xf32>
    %158 = arith.addf %157, %156 : vector<32x128xf32>
    %159 = vector.broadcast %29 : f32 to vector<32x128xf32>
    %160 = arith.mulf %159, %75 : vector<32x128xf32>
    %161 = arith.addf %158, %160 : vector<32x128xf32>
    %162 = vector.broadcast %30 : f32 to vector<32x128xf32>
    %163 = arith.mulf %162, %87 : vector<32x128xf32>
    %164 = arith.addf %161, %163 : vector<32x128xf32>
    %165 = vector.broadcast %31 : f32 to vector<32x128xf32>
    %166 = arith.mulf %165, %99 : vector<32x128xf32>
    %167 = arith.addf %164, %166 : vector<32x128xf32>
    %cst_12 = arith.constant 0.000000e+00 : f32
    %168 = vector.broadcast %cst_12 : f32 to vector<32x128xf32>
    %169 = arith.maximumf %167, %168 : vector<32x128xf32>
    %170 = vector.broadcast %39 : f32 to vector<32x128xf32>
    %171 = arith.mulf %170, %169 : vector<32x128xf32>
    %172 = arith.addf %154, %171 : vector<32x128xf32>
    %173 = arith.index_cast %42 : i32 to index
    %c0_13 = arith.constant 0 : index
    %174 = vector.load %arg3[%173, %c0_13] : memref<32x128xf32, #tpu.memory_space<vmem>>, vector<32x128xf32>
    tpu.vector_store %arg3[%173, %c0_13], %172 {strides = array<i32>} : memref<32x128xf32, #tpu.memory_space<vmem>>, vector<32x128xf32>,
    %c1_i32 = arith.constant 1 : i32
    return
  }
  func.func @transform_0(%arg0: i32) -> (i32, i32, i32) {
    %c0_i32 = arith.constant 0 : i32
    %c0_i32_0 = arith.constant 0 : i32
    %c0_i32_1 = arith.constant 0 : i32
    return %c0_i32, %arg0, %c0_i32_0 : i32, i32, i32
  }
  func.func @transform_1(%arg0: i32) -> i32 {
    %c0_i32 = arith.constant 0 : i32
    %c0_i32_0 = arith.constant 0 : i32
    return %c0_i32 : i32
  }
  func.func @transform_2(%arg0: i32) -> (i32, i32) {
    %c0_i32 = arith.constant 0 : i32
    %c0_i32_0 = arith.constant 0 : i32
    return %arg0, %c0_i32 : i32, i32
  }
}

</mosaic_0001>

<bundles_post_ra>
// kernel: tpu_custom_call.1
= control target key start
LH: loop header
LB: loop body
LE: loop exit
PB: predicated region body
PF: predicated region fallthrough
CT: control target
= control target key end

     0   :  { %7 = vsyncpa [#allocation3], 0  ;;  %s882_s0 = inlined_call_operand.hbm [shape: f32[3,32,128], index: 0, kind: input, shape index: {}]   ;;  %s883_s1 = inlined_call_operand.vmem [shape: f32[41], index: 1, kind: input, shape index: {}]   ;;  %s884_s2 = inlined_call_operand.hbm [shape: f32[32,128], index: 2, kind: output, shape index: {}]  }
   0x1   :  { %8 = vsyncpa [#allocation5], 0 }
   0x2   :  { %9 = vsyncpa [#allocation4], 0  ;;  %s556_s9 = smov [#allocation2]   ;;  %s28_s13 = sshll.u32 %s883_s1, 4  ;;  %s29_s13 = int_to_ptr.vmem [resolvable:$true] %s28_s13 }
   0x3   :  { %s15_s10 = sshll.u32 %s556_s9, 4  ;;  %s494_s16 = scalar_lea.hbm %s882_s0, 1536  ;;  %s16_s10 = int_to_ptr.vmem [resolvable:$true] %s15_s10 }
   0x4   :  { %p495_p0 = scmp.ne.s32.totalorder %s882_s0, %s494_s16  ;;  %p498_p1 = scmp.lt.u32.totalorder %s494_s16, %s882_s0 }
   0x6   :  { %p500_p2 = pnand %p498_p1, %p495_p0 }
   0x8   :  { %503 = shalt.err (!%p500_p2)
}
   0x9   :  { %s504_s21 = scalar_lea.vmem %s16_s10, 1536  ;;  %p509_p4 = scmp.lt.s32.totalorder %s16_s10, %s16_s10 }
   0xa   :  { %p505_p3 = scmp.ne.s32.totalorder %s16_s10, %s504_s21  ;;  %p510_p5 = scmp.lt.s32.totalorder %s504_s21, %s504_s21 }
   0xc   :  { %p511_p6 = por %p510_p5, %p509_p4 }
   0xe   :  { %p512_p7 = pnand %p511_p6, %p505_p3 }
  0x10   :  { %515 = shalt.err (!%p512_p7)
}
  0x11   :  { %s557_s1 = smov 128   ;;  %s558_s22 = smov 8  }
  0x12   :  { %21 = dma.hbm_to_vmem [thread:$0]  %s882_s0, 1536, %s16_s10, [#allocation3], %s557_s1, %s557_s1, %s558_s22  }
  0x13   :  { %s516_s25 = scalar_lea.vmem %s29_s13, 16  ;;  %p521_p9 = scmp.lt.s32.totalorder %s29_s13, %s29_s13 }
  0x14   :  { %p517_p8 = scmp.ne.s32.totalorder %s29_s13, %s516_s25  ;;  %p522_p10 = scmp.lt.s32.totalorder %s516_s25, %s516_s25 }
  0x16   :  { %p523_p11 = por %p522_p10, %p521_p9 }
  0x18   :  { %p524_p12 = pnand %p523_p11, %p517_p8 }
  0x1a   :  { %527 = shalt.err (!%p524_p12)
}
  0x1b   :  { %s559_s26 = smov [#allocation6]  }
  0x1c   :  { %31 = dma.vmem_to_smem %s29_s13, 16, %s559_s26, [#allocation5]  }
  0x1d   :  { %550 = dma.done.wait [#allocation3], 1536  }
  0x1e   :  { %551 = vsyncadd [#allocation3], 4294965760 }
  0x1f   :  { %552 = dma.done.wait [#allocation5], 16  }
  0x20   :  { %553 = vsyncadd [#allocation5], 4294967280 }
  0x21   :  { %38 = sfence }
  0x22   :  { %s39_s27 = sld [smem:[#allocation6]]  ;;  %s449_s28 = sld [smem:[#allocation6 + $0x1]]  ;;  %v594_v0 = vld [vmem:[#allocation2] sm:$0xff]  ;;  %v596_v1 = vld [vmem:[#allocation2 + $0x8] sm:$0xff]  ;;  %v598_v2 = vld [vmem:[#allocation2 + $0x10] sm:$0xff] }
  0x23   :  { %s450_s29 = sld [smem:[#allocation6 + $0x2]]  ;;  %s451_s30 = sld [smem:[#allocation6 + $0x3]]  ;;  %v600_v3 = vld [vmem:[#allocation2 + $0x18] sm:$0xff]  ;;  %v602_v4 = vld [vmem:[#allocation2 + $0x20] sm:$0xff]  ;;  %v604_v5 = vld [vmem:[#allocation2 + $0x28] sm:$0xff] }
  0x24   :  { %s452_s0 = sld [smem:[#allocation6 + $0x4]]  ;;  %s453_s3 = sld [smem:[#allocation6 + $0x5]]  ;;  %v606_v6 = vld [vmem:[#allocation2 + $0x30] sm:$0xff]  ;;  %v608_v7 = vld [vmem:[#allocation2 + $0x38] sm:$0xff]  ;;  %v610_v8 = vld [vmem:[#allocation2 + $0x40] sm:$0xff] }
  0x25   :  { %s460_s4 = sld [smem:[#allocation6 + $0xc]]  ;;  %s461_s5 = sld [smem:[#allocation6 + $0xd]]  ;;  %v612_v11 = vld [vmem:[#allocation2 + $0x48] sm:$0xff]  ;;  %v614_v12 = vld [vmem:[#allocation2 + $0x50] sm:$0xff]  ;;  %v616_v13 = vld [vmem:[#allocation2 + $0x58] sm:$0xff] }
  0x26   :  { %s636_s6 = sld [smem:[#allocation6 + $0x6]]  ;;  %s640_s8 = sld [smem:[#allocation6 + $0x7]] }
  0x27   :  { %s638_s7 = sld [smem:[#allocation6 + $0xe]]  ;;  %s642_s9 = sld [smem:[#allocation6 + $0x8]] }
  0x28   :  { %v96_v9 = vstv %s39_s27  ;;  %v106_v10 = vstv %s449_s28  ;;  %s652_s10 = sld [smem:[#allocation6 + $0x9]]  ;;  %s654_s11 = sld [smem:[#allocation6 + $0xf]] }
  0x29   :  { %v97_v14 = vmul.f32 %v96_v9, %v594_v0  ;;  %v98_v15 = vmul.f32 %v96_v9, %v596_v1  ;;  %v99_v16 = vmul.f32 %v96_v9, %v598_v2  ;;  %v100_v17 = vmul.f32 %v96_v9, %v600_v3  ;;  %s674_s12 = sld [smem:[#allocation6 + $0xa]]  ;;  %s676_s13 = sld [smem:[#allocation6 + $0xb]] }
  0x2a   :  { %v107_v18 = vmul.f32 %v106_v10, %v602_v4  ;;  %v108_v19 = vmul.f32 %v106_v10, %v604_v5  ;;  %v109_v20 = vmul.f32 %v106_v10, %v606_v6  ;;  %v110_v21 = vmul.f32 %v106_v10, %v608_v7  ;;  %s680_s14 = sld [smem:[#allocation6 + $0x10]]  ;;  %s704_s16 = sld [smem:[#allocation6 + $0x11]] }
  0x2b   :  { %v115_v22 = vstv %s450_s29  ;;  %v128_v23 = vstv %s451_s30  ;;  %v138_v24 = vstv %s452_s0  ;;  %v147_v25 = vstv %s453_s3  ;;  %s682_s15 = sld [smem:[#allocation6 + $0x20]]  ;;  %s708_s17 = sld [smem:[#allocation6 + $0x12]] }
  0x2c   :  { %v116_v26 = vmul.f32 %v115_v22, %v610_v8  ;;  %v117_v27 = vmul.f32 %v115_v22, %v612_v11  ;;  %v118_v28 = vmul.f32 %v115_v22, %v614_v12  ;;  %v119_v29 = vmul.f32 %v115_v22, %v616_v13  ;;  %s710_s18 = sld [smem:[#allocation6 + $0x13]]  ;;  %s728_s19 = sld [smem:[#allocation6 + $0x14]] }
  0x2d   :  { %v129_v30 = vmul.f32 %v128_v23, %v594_v0  ;;  %v130_v31 = vmul.f32 %v128_v23, %v596_v1  ;;  %v131_v32 = vmul.f32 %v128_v23, %v598_v2  ;;  %v132_v33 = vmul.f32 %v128_v23, %v600_v3  ;;  %s730_s20 = sld [smem:[#allocation6 + $0x24]]  ;;  %s734_s21 = sld [smem:[#allocation6 + $0x21]] }
  0x2e   :  { %v101_v34 = vstv %s460_s4  ;;  %v133_v35 = vstv %s461_s5  ;;  %v139_v36 = vmul.f32 %v138_v24, %v602_v4  ;;  %v140_v37 = vmul.f32 %v138_v24, %v604_v5  ;;  %s747_s23 = sld [smem:[#allocation6 + $0x15]]  ;;  %s761_s24 = sld [smem:[#allocation6 + $0x28]] }
  0x2f   :  { %v102_v38 = vadd.f32 %v101_v34, %v97_v14  ;;  %v103_v39 = vadd.f32 %v101_v34, %v98_v15  ;;  %v104_v40 = vadd.f32 %v101_v34, %v99_v16  ;;  %v105_v41 = vadd.f32 %v101_v34, %v100_v17  ;;  %s763_s25 = sld [smem:[#allocation6 + $0x16]]  ;;  %s767_s26 = sld [smem:[#allocation6 + $0x17]] }
  0x30   :  { %v134_v42 = vadd.f32 %v133_v35, %v129_v30  ;;  %v135_v43 = vadd.f32 %v133_v35, %v130_v31  ;;  %v136_v44 = vadd.f32 %v133_v35, %v131_v32  ;;  %v137_v45 = vadd.f32 %v133_v35, %v132_v33  ;;  %s769_s27 = sld [smem:[#allocation6 + $0x18]]  ;;  %s781_s28 = sld [smem:[#allocation6 + $0x22]] }
  0x31   :  { %v111_v46 = vadd.f32 %v107_v18, %v102_v38  ;;  %v112_v47 = vadd.f32 %v108_v19, %v103_v39  ;;  %v113_v48 = vadd.f32 %v109_v20, %v104_v40  ;;  %v114_v49 = vadd.f32 %v110_v21, %v105_v41  ;;  %s783_s29 = sld [smem:[#allocation6 + $0x25]]  ;;  %s786_s30 = sld [smem:[#allocation6 + $0x19]] }
  0x32   :  { %v141_v50 = vmul.f32 %v138_v24, %v606_v6  ;;  %v142_v51 = vmul.f32 %v138_v24, %v608_v7  ;;  %v143_v52 = vadd.f32 %v139_v36, %v134_v42  ;;  %v144_v53 = vadd.f32 %v140_v37, %v135_v43  ;;  %s791_s0 = sld [smem:[#allocation6 + $0x1a]]  ;;  %s793_s3 = sld [smem:[#allocation6 + $0x1b]] }
  0x33   :  { %v120_v54 = vadd.f32 %v116_v26, %v111_v46  ;;  %v121_v55 = vadd.f32 %v117_v27, %v112_v47  ;;  %v122_v56 = vadd.f32 %v118_v28, %v113_v48  ;;  %v123_v57 = vadd.f32 %v119_v29, %v114_v49  ;;  %s814_s4 = sld [smem:[#allocation6 + $0x1c]]  ;;  %s816_s5 = sld [smem:[#allocation6 + $0x23]] }
  0x34   :  { %v145_v58 = vadd.f32 %v141_v50, %v136_v44  ;;  %v146_v59 = vadd.f32 %v142_v51, %v137_v45  ;;  %v148_v60 = vmul.f32 %v147_v25, %v610_v8  ;;  %v149_v61 = vmul.f32 %v147_v25, %v612_v11 }
  0x35   :  { %v648_v62 = vmax.f32 %v120_v54, 0.0  ;;  %v150_v63 = vmul.f32 %v147_v25, %v614_v12  ;;  %v151_v9 = vmul.f32 %v147_v25, %v616_v13  ;;  %v656_v10 = vmax.f32 %v121_v55, 0.0 }
  0x36   :  { %v658_v14 = vmax.f32 %v122_v56, 0.0  ;;  %v152_v15 = vadd.f32 %v148_v60, %v143_v52  ;;  %v153_v16 = vadd.f32 %v149_v61, %v144_v53  ;;  %v660_v17 = vmax.f32 %v123_v57, 0.0 }
  0x37   :  { %v154_v18 = vadd.f32 %v150_v63, %v145_v58  ;;  %v160_v19 = vstv %s636_s6  ;;  %v165_v20 = vstv %s638_s7  ;;  %v155_v21 = vadd.f32 %v151_v9, %v146_v59  ;;  %s824_s6 = sld [smem:[#allocation6 + $0x1d]]  ;;  %s826_s7 = sld [smem:[#allocation6 + $0x26]] }
  0x38   :  { %v664_v22 = vmax.f32 %v152_v15, 0.0  ;;  %v161_v23 = vmul.f32 %v160_v19, %v594_v0  ;;  %v162_v24 = vmul.f32 %v160_v19, %v596_v1  ;;  %v668_v25 = vmax.f32 %v153_v16, 0.0 }
  0x39   :  { %v670_v26 = vmax.f32 %v154_v18, 0.0  ;;  %v163_v27 = vmul.f32 %v160_v19, %v598_v2  ;;  %v164_v28 = vmul.f32 %v160_v19, %v600_v3  ;;  %v170_v31 = vstv %s640_s8  ;;  %s838_s8 = sld [smem:[#allocation6 + $0x1e]] }
  0x3a   :  { %v166_v29 = vadd.f32 %v165_v20, %v161_v23  ;;  %v167_v30 = vadd.f32 %v165_v20, %v162_v24  ;;  %v179_v32 = vstv %s642_s9  ;;  %v171_v35 = vmul.f32 %v170_v31, %v602_v4  ;;  %s840_s9 = sld [smem:[#allocation6 + $0x1f]] }
  0x3b   :  { %v168_v33 = vadd.f32 %v165_v20, %v163_v27  ;;  %v169_v34 = vadd.f32 %v165_v20, %v164_v28  ;;  %v172_v36 = vmul.f32 %v170_v31, %v604_v5  ;;  %v173_v37 = vmul.f32 %v170_v31, %v606_v6 }
  0x3c   :  { %v174_v38 = vmul.f32 %v170_v31, %v608_v7  ;;  %v180_v39 = vmul.f32 %v179_v32, %v610_v8  ;;  %v181_v40 = vmul.f32 %v179_v32, %v612_v11  ;;  %v175_v41 = vadd.f32 %v171_v35, %v166_v29 }
  0x3d   :  { %v176_v42 = vadd.f32 %v172_v36, %v167_v30  ;;  %v182_v43 = vmul.f32 %v179_v32, %v614_v12  ;;  %v183_v44 = vmul.f32 %v179_v32, %v616_v13  ;;  %v177_v45 = vadd.f32 %v173_v37, %v168_v33 }
  0x3e   :  { %v178_v46 = vadd.f32 %v174_v38, %v169_v34  ;;  %v192_v47 = vstv %s652_s10  ;;  %v197_v48 = vstv %s654_s11  ;;  %v184_v49 = vadd.f32 %v180_v39, %v175_v41  ;;  %s854_s10 = sld [smem:[#allocation6 + $0x27]]  ;;  %s560_s11 = smov [#allocation7]  }
  0x3f   :  { %v185_v50 = vadd.f32 %v181_v40, %v176_v42  ;;  %v193_v51 = vmul.f32 %v192_v47, %v594_v0  ;;  %v194_v52 = vmul.f32 %v192_v47, %v596_v1  ;;  %v696_v53 = vmax.f32 %v155_v21, 0.0 }
  0x40   :  { %v186_v54 = vadd.f32 %v182_v43, %v177_v45  ;;  %v195_v55 = vmul.f32 %v192_v47, %v598_v2  ;;  %v196_v56 = vmul.f32 %v192_v47, %v600_v3  ;;  %v187_v57 = vadd.f32 %v183_v44, %v178_v46 }
  0x41   :  { %v700_v58 = vmax.f32 %v184_v49, 0.0  ;;  %v702_v59 = vmax.f32 %v185_v50, 0.0  ;;  %v198_v60 = vadd.f32 %v197_v48, %v193_v51  ;;  %v199_v1 = vadd.f32 %v197_v48, %v194_v52 }
  0x42   :  { %v706_v0 = vmax.f32 %v186_v54, 0.0  ;;  %v200_v61 = vadd.f32 %v197_v48, %v195_v55  ;;  %v201_v63 = vadd.f32 %v197_v48, %v196_v56  ;;  %v202_v2 = vstv %s674_s12  ;;  %s434_s12 = sshll.u32 %s560_s11, 4  ;;  %s435_s12 = int_to_ptr.vmem [resolvable:$true] %s434_s12 }
  0x43   :  { %v211_v9 = vstv %s676_s13  ;;  %v224_v3 = vstv %s680_s14  ;;  %v229_v15 = vstv %s682_s15  ;;  %v203_v16 = vmul.f32 %v202_v2, %v602_v4  ;;  %s528_s13 = scalar_lea.vmem %s435_s12, 512  ;;  %p533_p0 = scmp.lt.s32.totalorder %s435_s12, %s435_s12 }
  0x44   :  { %v204_v18 = vmul.f32 %v202_v2, %v604_v5  ;;  %v205_v19 = vmul.f32 %v202_v2, %v606_v6  ;;  %v206_v20 = vmul.f32 %v202_v2, %v608_v7  ;;  %v212_v21 = vmul.f32 %v211_v9, %v610_v8  ;;  %p529_p13 = scmp.ne.s32.totalorder %s435_s12, %s528_s13  ;;  %p534_p1 = scmp.lt.s32.totalorder %s528_s13, %s528_s13 }
  0x45   :  { %v213_v23 = vmul.f32 %v211_v9, %v612_v11  ;;  %v214_v24 = vmul.f32 %v211_v9, %v614_v12  ;;  %v215_v27 = vmul.f32 %v211_v9, %v616_v13  ;;  %v207_v28 = vadd.f32 %v203_v16, %v198_v60 }
  0x46   :  { %v208_v29 = vadd.f32 %v204_v18, %v199_v1  ;;  %v209_v30 = vadd.f32 %v205_v19, %v200_v61  ;;  %v210_v31 = vadd.f32 %v206_v20, %v201_v63  ;;  %v225_v4 = vmul.f32 %v224_v3, %v648_v62  ;;  %p535_p2 = por %p534_p1, %p533_p0 }
  0x47   :  { %v226_v5 = vmul.f32 %v224_v3, %v656_v10  ;;  %v227_v6 = vmul.f32 %v224_v3, %v658_v14  ;;  %v228_v7 = vmul.f32 %v224_v3, %v660_v17  ;;  %v216_v32 = vadd.f32 %v212_v21, %v207_v28 }
  0x48   :  { %v217_v8 = vadd.f32 %v213_v23, %v208_v29  ;;  %v218_v11 = vadd.f32 %v214_v24, %v209_v30  ;;  %v219_v12 = vadd.f32 %v215_v27, %v210_v31  ;;  %v732_v13 = vmax.f32 %v187_v57, 0.0  ;;  %p536_p3 = pnand %p535_p2, %p529_p13 }
  0x49   :  { %v230_v33 = vadd.f32 %v229_v15, %v225_v4  ;;  %v231_v34 = vadd.f32 %v229_v15, %v226_v5  ;;  %v232_v35 = vadd.f32 %v229_v15, %v227_v6  ;;  %v736_v36 = vmax.f32 %v216_v32, 0.0 }
  0x4a   :  { %v738_v37 = vmax.f32 %v217_v8, 0.0  ;;  %v740_v38 = vmax.f32 %v218_v11, 0.0  ;;  %v233_v39 = vadd.f32 %v229_v15, %v228_v7  ;;  %v742_v40 = vmax.f32 %v219_v12, 0.0 }
  0x4b   :  { %v234_v41 = vstv %s704_s16  ;;  %v243_v42 = vstv %s708_s17  ;;  %v252_v43 = vstv %s710_s18  ;;  %v265_v15 = vstv %s730_s20 }
  0x4c   :  { %v235_v44 = vmul.f32 %v234_v41, %v664_v22  ;;  %v236_v45 = vmul.f32 %v234_v41, %v668_v25  ;;  %v237_v46 = vmul.f32 %v234_v41, %v670_v26  ;;  %v238_v47 = vmul.f32 %v234_v41, %v696_v53 }
  0x4d   :  { %v244_v48 = vmul.f32 %v243_v42, %v700_v58  ;;  %v245_v49 = vmul.f32 %v243_v42, %v702_v59  ;;  %v246_v50 = vmul.f32 %v243_v42, %v706_v0  ;;  %v247_v51 = vmul.f32 %v243_v42, %v732_v13 }
  0x4e   :  { %v239_v52 = vadd.f32 %v235_v44, %v230_v33  ;;  %v240_v54 = vadd.f32 %v236_v45, %v231_v34  ;;  %v241_v55 = vadd.f32 %v237_v46, %v232_v35  ;;  %v242_v56 = vadd.f32 %v238_v47, %v233_v39 }
  0x4f   :  { %v253_v57 = vmul.f32 %v252_v43, %v736_v36  ;;  %v254_v60 = vmul.f32 %v252_v43, %v738_v37  ;;  %v255_v1 = vmul.f32 %v252_v43, %v740_v38  ;;  %v256_v61 = vmul.f32 %v252_v43, %v742_v40 }
  0x50   :  { %v248_v63 = vadd.f32 %v244_v48, %v239_v52  ;;  %v249_v2 = vadd.f32 %v245_v49, %v240_v54  ;;  %v250_v9 = vadd.f32 %v246_v50, %v241_v55  ;;  %v251_v3 = vadd.f32 %v247_v51, %v242_v56 }
  0x51   :  { %v275_v16 = vstv %s728_s19  ;;  %v280_v21 = vstv %s734_s21  ;;  %v285_v4 = vstv %s747_s23  ;;  %v270_v42 = vstv %s761_s24 }
  0x52   :  { %v257_v18 = vadd.f32 %v253_v57, %v248_v63  ;;  %v258_v19 = vadd.f32 %v254_v60, %v249_v2  ;;  %v259_v20 = vadd.f32 %v255_v1, %v250_v9  ;;  %v276_v23 = vmul.f32 %v275_v16, %v648_v62 }
  0x53   :  { %v277_v24 = vmul.f32 %v275_v16, %v656_v10  ;;  %v278_v27 = vmul.f32 %v275_v16, %v658_v14  ;;  %v279_v28 = vmul.f32 %v275_v16, %v660_v17  ;;  %v260_v29 = vadd.f32 %v256_v61, %v251_v3 }
  0x54   :  { %v261_v30 = vmax.f32 %v257_v18, 0.0  ;;  %v262_v31 = vmax.f32 %v258_v19, 0.0  ;;  %v281_v5 = vadd.f32 %v280_v21, %v276_v23  ;;  %v263_v8 = vmax.f32 %v259_v20, 0.0 }
  0x55   :  { %v282_v6 = vadd.f32 %v280_v21, %v277_v24  ;;  %v283_v7 = vadd.f32 %v280_v21, %v278_v27  ;;  %v284_v32 = vadd.f32 %v280_v21, %v279_v28  ;;  %v286_v11 = vmul.f32 %v285_v4, %v664_v22 }
  0x56   :  { %v287_v12 = vmul.f32 %v285_v4, %v668_v25  ;;  %v288_v33 = vmul.f32 %v285_v4, %v670_v26  ;;  %v289_v34 = vmul.f32 %v285_v4, %v696_v53  ;;  %v264_v35 = vmax.f32 %v260_v29, 0.0 }
  0x57   :  { %v266_v39 = vmul.f32 %v265_v15, %v261_v30  ;;  %v267_v41 = vmul.f32 %v265_v15, %v262_v31  ;;  %v290_v43 = vadd.f32 %v286_v11, %v281_v5  ;;  %v268_v47 = vmul.f32 %v265_v15, %v263_v8 }
  0x58   :  { %v291_v44 = vadd.f32 %v287_v12, %v282_v6  ;;  %v292_v45 = vadd.f32 %v288_v33, %v283_v7  ;;  %v293_v46 = vadd.f32 %v289_v34, %v284_v32  ;;  %v294_v48 = vstv %s763_s25 }
  0x59   :  { %v303_v49 = vstv %s767_s26  ;;  %v325_v50 = vstv %s769_s27  ;;  %v295_v51 = vmul.f32 %v294_v48, %v700_v58  ;;  %v296_v52 = vmul.f32 %v294_v48, %v702_v59 }
  0x5a   :  { %v297_v54 = vmul.f32 %v294_v48, %v706_v0  ;;  %v298_v55 = vmul.f32 %v294_v48, %v732_v13  ;;  %v304_v56 = vmul.f32 %v303_v49, %v736_v36  ;;  %v305_v57 = vmul.f32 %v303_v49, %v738_v37 }
  0x5b   :  { %v306_v60 = vmul.f32 %v303_v49, %v740_v38  ;;  %v307_v1 = vmul.f32 %v303_v49, %v742_v40  ;;  %v299_v61 = vadd.f32 %v295_v51, %v290_v43  ;;  %v300_v63 = vadd.f32 %v296_v52, %v291_v44 }
  0x5c   :  { %v301_v2 = vadd.f32 %v297_v54, %v292_v45  ;;  %v302_v9 = vadd.f32 %v298_v55, %v293_v46  ;;  %v326_v3 = vmul.f32 %v325_v50, %v648_v62  ;;  %v327_v16 = vmul.f32 %v325_v50, %v656_v10 }
  0x5d   :  { %v328_v18 = vmul.f32 %v325_v50, %v658_v14  ;;  %v329_v19 = vmul.f32 %v325_v50, %v660_v17  ;;  %v269_v20 = vmul.f32 %v265_v15, %v264_v35  ;;  %v807_v21 = vadd.f32 %v270_v42, %v266_v39 }
  0x5e   :  { %v308_v23 = vadd.f32 %v304_v56, %v299_v61  ;;  %v309_v24 = vadd.f32 %v305_v57, %v300_v63  ;;  %v809_v27 = vadd.f32 %v270_v42, %v267_v41  ;;  %v310_v28 = vadd.f32 %v306_v60, %v301_v2 }
  0x5f   :  { %v316_v29 = vstv %s783_s29  ;;  %v330_v30 = vstv %s781_s28  ;;  %v311_v31 = vadd.f32 %v307_v1, %v302_v9  ;;  %v335_v6 = vstv %s786_s30 }
  0x60   :  { %v312_v4 = vmax.f32 %v308_v23, 0.0  ;;  %v313_v5 = vmax.f32 %v309_v24, 0.0  ;;  %v331_v15 = vadd.f32 %v330_v30, %v326_v3  ;;  %v332_v7 = vadd.f32 %v330_v30, %v327_v16 }
  0x61   :  { %v333_v32 = vadd.f32 %v330_v30, %v328_v18  ;;  %v334_v8 = vadd.f32 %v330_v30, %v329_v19  ;;  %v273_v11 = vadd.f32 %v270_v42, %v268_v47  ;;  %v274_v12 = vadd.f32 %v270_v42, %v269_v20 }
  0x62   :  { %v344_v33 = vstv %s791_s0  ;;  %v353_v34 = vstv %s793_s3  ;;  %v336_v35 = vmul.f32 %v335_v6, %v664_v22  ;;  %v337_v39 = vmul.f32 %v335_v6, %v668_v25 }
  0x63   :  { %v338_v41 = vmul.f32 %v335_v6, %v670_v26  ;;  %v339_v43 = vmul.f32 %v335_v6, %v696_v53  ;;  %v314_v44 = vmax.f32 %v310_v28, 0.0  ;;  %v315_v45 = vmax.f32 %v311_v31, 0.0 }
  0x64   :  { %v317_v46 = vmul.f32 %v316_v29, %v312_v4  ;;  %v318_v48 = vmul.f32 %v316_v29, %v313_v5  ;;  %v340_v47 = vadd.f32 %v336_v35, %v331_v15  ;;  %v341_v42 = vadd.f32 %v337_v39, %v332_v7 }
  0x65   :  { %v342_v49 = vadd.f32 %v338_v41, %v333_v32  ;;  %v343_v50 = vadd.f32 %v339_v43, %v334_v8  ;;  %v345_v51 = vmul.f32 %v344_v33, %v700_v58  ;;  %v346_v52 = vmul.f32 %v344_v33, %v702_v59 }
  0x66   :  { %v347_v54 = vmul.f32 %v344_v33, %v706_v0  ;;  %v348_v55 = vmul.f32 %v344_v33, %v732_v13  ;;  %v354_v56 = vmul.f32 %v353_v34, %v736_v36  ;;  %v355_v57 = vmul.f32 %v353_v34, %v738_v37 }
  0x67   :  { %v356_v60 = vmul.f32 %v353_v34, %v740_v38  ;;  %v357_v1 = vmul.f32 %v353_v34, %v742_v40  ;;  %v349_v61 = vadd.f32 %v345_v51, %v340_v47  ;;  %v350_v63 = vadd.f32 %v346_v52, %v341_v42 }
  0x68   :  { %v351_v2 = vadd.f32 %v347_v54, %v342_v49  ;;  %v352_v9 = vadd.f32 %v348_v55, %v343_v50  ;;  %v319_v3 = vmul.f32 %v316_v29, %v314_v44  ;;  %v320_v16 = vmul.f32 %v316_v29, %v315_v45 }
  0x69   :  { %v375_v18 = vstv %s814_s4  ;;  %v380_v19 = vstv %s816_s5  ;;  %v358_v20 = vadd.f32 %v354_v56, %v349_v61  ;;  %v359_v23 = vadd.f32 %v355_v57, %v350_v63 }
  0x6a   :  { %v360_v24 = vadd.f32 %v356_v60, %v351_v2  ;;  %v361_v28 = vadd.f32 %v357_v1, %v352_v9  ;;  %v376_v30 = vmul.f32 %v375_v18, %v648_v62  ;;  %v377_v31 = vmul.f32 %v375_v18, %v656_v10 }
  0x6b   :  { %v378_v4 = vmul.f32 %v375_v18, %v658_v14  ;;  %v379_v5 = vmul.f32 %v375_v18, %v660_v17  ;;  %v362_v29 = vmax.f32 %v358_v20, 0.0  ;;  %v363_v6 = vmax.f32 %v359_v23, 0.0 }
  0x6c   :  { %v366_v15 = vstv %s826_s7  ;;  %v385_v7 = vstv %s824_s6  ;;  %v381_v32 = vadd.f32 %v380_v19, %v376_v30  ;;  %v382_v8 = vadd.f32 %v380_v19, %v377_v31 }
  0x6d   :  { %v383_v33 = vadd.f32 %v380_v19, %v378_v4  ;;  %v384_v34 = vadd.f32 %v380_v19, %v379_v5  ;;  %v321_v35 = vadd.f32 %v317_v46, %v807_v21  ;;  %v322_v39 = vadd.f32 %v318_v48, %v809_v27 }
  0x6e   :  { %v364_v41 = vmax.f32 %v360_v24, 0.0  ;;  %v365_v62 = vmax.f32 %v361_v28, 0.0  ;;  %v386_v10 = vmul.f32 %v385_v7, %v664_v22  ;;  %v387_v14 = vmul.f32 %v385_v7, %v668_v25 }
  0x6f   :  { %v388_v17 = vmul.f32 %v385_v7, %v670_v26  ;;  %v389_v43 = vmul.f32 %v385_v7, %v696_v53  ;;  %v323_v44 = vadd.f32 %v319_v3, %v273_v11  ;;  %v324_v45 = vadd.f32 %v320_v16, %v274_v12 }
  0x70   :  { %v367_v47 = vmul.f32 %v366_v15, %v362_v29  ;;  %v368_v21 = vmul.f32 %v366_v15, %v363_v6  ;;  %v390_v46 = vadd.f32 %v386_v10, %v381_v32  ;;  %v391_v27 = vadd.f32 %v387_v14, %v382_v8 }
  0x71   :  { %v392_v48 = vadd.f32 %v388_v17, %v383_v33  ;;  %v393_v42 = vadd.f32 %v389_v43, %v384_v34  ;;  %v369_v49 = vmul.f32 %v366_v15, %v364_v41  ;;  %v370_v50 = vmul.f32 %v366_v15, %v365_v62 }
  0x72   :  { %v394_v22 = vstv %s838_s8  ;;  %v403_v51 = vstv %s840_s9  ;;  %v372_v2 = vadd.f32 %v368_v21, %v322_v39 }
  0x73   :  { %v395_v25 = vmul.f32 %v394_v22, %v700_v58  ;;  %v396_v26 = vmul.f32 %v394_v22, %v702_v59  ;;  %v397_v53 = vmul.f32 %v394_v22, %v706_v0  ;;  %v398_v52 = vmul.f32 %v394_v22, %v732_v13 }
  0x74   :  { %v404_v11 = vmul.f32 %v403_v51, %v736_v36  ;;  %v405_v12 = vmul.f32 %v403_v51, %v738_v37  ;;  %v406_v54 = vmul.f32 %v403_v51, %v740_v38  ;;  %v407_v55 = vmul.f32 %v403_v51, %v742_v40 }
  0x75   :  { %v399_v56 = vadd.f32 %v395_v25, %v390_v46  ;;  %v400_v57 = vadd.f32 %v396_v26, %v391_v27  ;;  %v401_v60 = vadd.f32 %v397_v53, %v392_v48  ;;  %v402_v1 = vadd.f32 %v398_v52, %v393_v42 }
  0x76   :  { %v371_v58 = vadd.f32 %v367_v47, %v321_v35  ;;  %v373_v13 = vadd.f32 %v369_v49, %v323_v44  ;;  %v374_v9 = vadd.f32 %v370_v50, %v324_v45  ;;  %v416_v36 = vstv %s854_s10 }
  0x77   :  { %v408_v61 = vadd.f32 %v404_v11, %v399_v56  ;;  %v409_v59 = vadd.f32 %v405_v12, %v400_v57  ;;  %v410_v63 = vadd.f32 %v406_v54, %v401_v60  ;;  %v411_v0 = vadd.f32 %v407_v55, %v402_v1 }
  0x79   :  { %v412_v3 = vmax.f32 %v408_v61, 0.0  ;;  %v413_v16 = vmax.f32 %v409_v59, 0.0  ;;  %v414_v37 = vmax.f32 %v410_v63, 0.0  ;;  %v415_v18 = vmax.f32 %v411_v0, 0.0 }
  0x7b   :  { %v417_v38 = vmul.f32 %v416_v36, %v412_v3  ;;  %v418_v40 = vmul.f32 %v416_v36, %v413_v16  ;;  %v419_v19 = vmul.f32 %v416_v36, %v414_v37  ;;  %v420_v20 = vmul.f32 %v416_v36, %v415_v18 }
  0x7d   :  { %v421_v23 = vadd.f32 %v417_v38, %v371_v58  ;;  %v422_v24 = vadd.f32 %v418_v40, %v372_v2  ;;  %v423_v28 = vadd.f32 %v419_v19, %v373_v13  ;;  %v424_v30 = vadd.f32 %v420_v20, %v374_v9 }
  0x7f   :  { %425 = vst [vmem:[#allocation7] sm:$0xff] %v421_v23  ;;  %426 = vst [vmem:[#allocation7 + $0x8] sm:$0xff] %v422_v24 }
  0x80   :  { %427 = vst [vmem:[#allocation7 + $0x10] sm:$0xff] %v423_v28  ;;  %428 = vst [vmem:[#allocation7 + $0x18] sm:$0xff] %v424_v30 }
  0x81   :  { %539 = shalt.err (!%p536_p3)
}
  0x82   :  { %s540_s16 = scalar_lea.hbm %s884_s2, 512 }
  0x83   :  { %p541_p4 = scmp.ne.s32.totalorder %s884_s2, %s540_s16  ;;  %p544_p5 = scmp.lt.u32.totalorder %s540_s16, %s884_s2 }
  0x85   :  { %p546_p6 = pnand %p544_p5, %p541_p4 }
  0x87   :  { %549 = shalt.err (!%p546_p6)
}
  0x88   :  { %440 = dma.vmem_to_hbm [thread:$0]  %s435_s12, 512, %s884_s2, [#allocation4], %s557_s1, %s557_s1, %s558_s22  }
  0x89   :  { %554 = dma.done.wait [#allocation4], 512  }
  0x8a   :  { %555 = vsyncadd [#allocation4], 4294966784 }
  0x8b   :  { %444 = vsyncpa [#allocation3], 1 }
  0x8c   :  { %445 = vsyncpa [#allocation4], 1 }
  0x8d   :  { %446 = vsyncpa [#allocation5], 1 }

</bundles_post_ra>
